<compile_context>
chip_gen: v6e
topology: v6e:2x2x1
jax: 0.10.0
libtpu: 0.0.40
codegen_flags: <defaults>
</compile_context>

<pallas_src>
import jax
import jax.numpy as jnp
from jax import lax
from jax.experimental import pallas as pl
from jax.experimental.pallas import tpu as pltpu


def _round_up(v, m):
    return (v + m - 1) // m * m


def _vmem_limit_bytes():
    """Per-generation scoped-VMEM limit: ~70% of physical, capped at 96 MiB."""
    try:
        cap = pltpu.get_tpu_info().vmem_capacity_bytes
    except Exception:
        cap = 64 * 1024 * 1024          # conservative: v7x has the smallest VMEM
    return min(96 * 1024 * 1024, int(cap * 0.70))


def _plan_tiles(batch, input_num, hidden_num, output_num, vmem_limit):
    """Pick (batch_tile, padded_batch, hidden_tile, padded_hidden).

    Accounting (f32, worst case): weights double-buffered by the pipeline,
    x/out double-buffered, the (tb, th) fc1 activation and the (tb, O) f32
    accumulator resident.
    """
    budget = vmem_limit - 2 * 1024 * 1024            # headroom for internal scratch

    def weight_tile_bytes(th):
        # 2 pipeline buffers each for w1t (I, th), b1 (1, th), w2t (th, O).
        return 2 * 4 * (input_num * th + th + th * output_num)

    if weight_tile_bytes(hidden_num) <= budget // 2:
        th = hidden_num                               # weights fully resident
    else:
        # Tile the hidden (reduction) dimension so weight tiles fit in ~half
        # the budget (v7x's 64 MiB VMEM is the binding case).
        th = (budget // 2) // (2 * 4 * (input_num + 1 + output_num))
        th = max(128, th // 128 * 128)                # lane-aligned hidden tile
        # TODO(synk): extremely large input_num would additionally need an
        # input-dim K-loop; not implemented.
    hidden_p = _round_up(hidden_num, th)

    # Batch tile: fill the remaining budget (2x x, activation, 2x out, acc).
    per_row = 4 * (2 * input_num + th + 3 * output_num)
    remaining = budget - weight_tile_bytes(th)
    tb_max = max(128, remaining // per_row // 128 * 128)

    batch_p = _round_up(batch, 8)
    if batch_p <= 256:
        tb = batch_p                                  # one tile; too little work to split
    else:
        # >= 2 batch tiles so both v7x TensorCores get work on the "parallel"
        # axis, but otherwise as large as the VMEM budget allows (fewer grid
        # steps => amortized per-step overhead, bigger DMAs).
        tb = min(tb_max, _round_up(-(-batch_p // 2), 128))
    batch_p = _round_up(batch_p, tb)
    return tb, batch_p, th, hidden_p


def _mlp_kernel(b2_ref, x_ref, w1_ref, b1_ref, w2_ref, o_ref, acc_ref):
    """One (batch-tile, hidden-tile) step of sigmoid(relu(x@W1.T+b1)@W2.T+b2).

    b2_ref : SMEM (O,)     fc2 bias (scalar prefetch)
    x_ref  : (TB, I)       input batch tile
    w1_ref : (I, TH)       fc1 weight tile (pre-transposed in the wrapper)
    b1_ref : (1, TH)       fc1 bias tile
    w2_ref : (TH, O)       fc2 weight tile (pre-transposed in the wrapper)
    o_ref  : (TB, O)       output tile (written on the last hidden step)
    acc_ref: (TB, O) f32   fc2 partial-sum accumulator across hidden tiles
    """
    j = pl.program_id(1)

    @pl.when(j == 0)
    def _():
        acc_ref[...] = jnp.zeros_like(acc_ref)

    # fc1: plain (TB, I) x (I, TH) MXU contraction; bias + ReLU on the VPU (f32).
    h = lax.dot_general(x_ref[...], w1_ref[...],
                        dimension_numbers=(((1,), (0,)), ((), ())),
                        preferred_element_type=jnp.float32)
    h = jnp.maximum(h + b1_ref[...], 0.0)

    # fc2 partial sum for this hidden tile: (TB, TH) x (TH, O) -> (TB, O).
    acc_ref[...] += lax.dot_general(h.astype(w2_ref.dtype), w2_ref[...],
                                    dimension_numbers=(((1,), (0,)), ((), ())),
                                    preferred_element_type=jnp.float32)

    @pl.when(j == pl.num_programs(1) - 1)
    def _():
        o_ref[...] = jax.nn.sigmoid(acc_ref[...] + b2_ref[0]).astype(o_ref.dtype)


def basic_bp_forward(x, weight, input_num, hidden_num, output_num, use_bf16=False):
    """Slice the flat weight vector exactly like the PyTorch __init__, then run
    the fused 2-layer MLP as a batch-tiled (and, if needed, hidden-tiled)
    Pallas kernel."""
    assert output_num == 1, "module's flat-weight slicing requires output_num == 1"
    n1 = input_num * hidden_num
    w1 = weight[:n1].reshape(hidden_num, input_num)                     # fc1.weight
    b1 = weight[n1:n1 + hidden_num].reshape(1, hidden_num)              # fc1.bias
    w2 = weight[n1 + hidden_num:n1 + 2 * hidden_num].reshape(
        output_num, hidden_num)                                         # fc2.weight
    b2 = weight[n1 + 2 * hidden_num:].reshape(output_num)               # fc2.bias

    # One-time wrapper-side transposes: both in-kernel matmuls become plain
    # (M,K)x(K,N) contractions with no per-tile operand relayout.
    w1t = w1.T                                                          # (I, H)
    w2t = w2.T                                                          # (H, O)

    out_dtype = x.dtype
    if use_bf16:
        # TODO(synk): optional bandwidth optimization; needs ~1e-2 tolerance.
        x = x.astype(jnp.bfloat16)
        w1t = w1t.astype(jnp.bfloat16)
        w2t = w2t.astype(jnp.bfloat16)

    batch = x.shape[0]
    vmem_limit = _vmem_limit_bytes()
    tb, batch_p, th, hidden_p = _plan_tiles(batch, input_num, hidden_num,
                                            output_num, vmem_limit)
    n_b, n_h = batch_p // tb, hidden_p // th

    if batch_p != batch:
        x = jnp.pad(x, ((0, batch_p - batch), (0, 0)))
    if hidden_p != hidden_num:
        # Zero-padded hidden units: relu(0 + 0) = 0 and contribute 0 to fc2.
        hp = hidden_p - hidden_num
        w1t = jnp.pad(w1t, ((0, 0), (0, hp)))
        b1 = jnp.pad(b1, ((0, 0), (0, hp)))
        w2t = jnp.pad(w2t, ((0, hp), (0, 0)))

    grid_spec = pltpu.PrefetchScalarGridSpec(
        num_scalar_prefetch=1,                                          # b2 -> SMEM
        grid=(n_b, n_h),                                                # reduction axis last
        in_specs=[
            pl.BlockSpec((tb, input_num), lambda i, j, b2: (i, 0)),     # x tile
            pl.BlockSpec((input_num, th), lambda i, j, b2: (0, j)),     # w1t tile
            pl.BlockSpec((1, th), lambda i, j, b2: (0, j)),             # b1 tile
            pl.BlockSpec((th, output_num), lambda i, j, b2: (j, 0)),    # w2t tile
        ],
        out_specs=pl.BlockSpec((tb, output_num), lambda i, j, b2: (i, 0)),
        scratch_shapes=[pltpu.VMEM((tb, output_num), jnp.float32)],     # fc2 accumulator
    )

    itemsize = x.dtype.itemsize
    cost = pl.CostEstimate(
        flops=2 * batch_p * (input_num * hidden_p + hidden_p * output_num),
        transcendentals=batch_p * output_num,
        bytes_accessed=(itemsize * batch_p * input_num
                        + n_b * (itemsize * hidden_p * (input_num + output_num)
                                 + 4 * hidden_p)
                        + 4 * output_num
                        + out_dtype.itemsize * batch_p * output_num),
    )

    out = pl.pallas_call(
        _mlp_kernel,
        out_shape=jax.ShapeDtypeStruct((batch_p, output_num), out_dtype),
        grid_spec=grid_spec,
        compiler_params=pltpu.CompilerParams(
            # batch tiles are independent -> shard across v7x's two TensorCores;
            # hidden is a reduction carried in acc_ref -> "arbitrary".
            dimension_semantics=("parallel", "arbitrary"),
            vmem_limit_bytes=vmem_limit,
        ),
        cost_estimate=cost,
    )(b2, x, w1t, b1, w2t)

    return out[:batch]


def _reference(x, weight, input_num, hidden_num, output_num):
    n1 = input_num * hidden_num
    w1 = weight[:n1].reshape(hidden_num, input_num)
    b1 = weight[n1:n1 + hidden_num]
    w2 = weight[n1 + hidden_num:n1 + 2 * hidden_num].reshape(output_num, hidden_num)
    b2 = weight[n1 + 2 * hidden_num:]
    h = jnp.maximum(x @ w1.T + b1, 0.0)
    return jax.nn.sigmoid(h @ w2.T + b2)


if __name__ == "__main__":
    # Small shapes consistent with the module (output_num must be 1).
    input_num, hidden_num, output_num = 16, 32, 1
    weight_len = (input_num * hidden_num + hidden_num
                  + hidden_num * output_num + output_num)

    key = jax.random.PRNGKey(0)
    kx, kw, kx2 = jax.random.split(key, 3)
    weight = jax.random.normal(kw, (weight_len,), dtype=jnp.float32) * 0.1

    # 1) Tiny batch: single tile / single grid step.
    x = jax.random.normal(kx, (8, input_num), dtype=jnp.float32)
    out = jax.block_until_ready(
        basic_bp_forward(x, weight, input_num, hidden_num, output_num))
    ref = _reference(x, weight, input_num, hidden_num, output_num)
    assert out.shape == (8, output_num)
    assert jnp.allclose(out, ref, atol=1e-5, rtol=1e-5), "mismatch (single tile)"

    # 2) Non-multiple batch: exercises padding + the >=2-tile "parallel" path.
    x2 = jax.random.normal(kx2, (300, input_num), dtype=jnp.float32)
    out2 = jax.block_until_ready(
        basic_bp_forward(x2, weight, input_num, hidden_num, output_num))
    ref2 = _reference(x2, weight, input_num, hidden_num, output_num)
    assert out2.shape == (300, output_num)
    assert jnp.allclose(out2, ref2, atol=1e-5, rtol=1e-5), "mismatch (multi tile)"

    print("KERNEL_OK")
</pallas_src>

<mosaic_0001>
module attributes {stable_mosaic.version = 11 : i64} {
  func.func @_mlp_kernel(%arg0: i32, %arg1: i32, %arg2: memref<1xf32, #tpu.memory_space<smem>>, %arg3: memref<8x16xf32, #tpu.memory_space<vmem>>, %arg4: memref<16x32xf32, #tpu.memory_space<vmem>>, %arg5: memref<1x32xf32, #tpu.memory_space<vmem>>, %arg6: memref<32x1xf32, #tpu.memory_space<vmem>>, %arg7: memref<8x1xf32, #tpu.memory_space<vmem>>, %arg8: memref<8x1xf32, #tpu.memory_space<vmem>>) attributes {dimension_semantics = [#tpu.dimension_semantics<parallel>, #tpu.dimension_semantics<arbitrary>], iteration_bounds = array<i64: 1, 1>, scalar_prefetch = 1 : i64, scratch_operands = 1 : i64, tpu.core_type = #tpu.core_type<tc>, window_params = [{transform_indices = @transform_0, window_bounds = array<i64: 8, 16>}, {transform_indices = @transform_1, window_bounds = array<i64: 16, 32>}, {transform_indices = @transform_2, window_bounds = array<i64: 1, 32>}, {transform_indices = @transform_3, window_bounds = array<i64: 32, 1>}, {transform_indices = @transform_4, window_bounds = array<i64: 8, 1>}]} {
    %c0_i32 = arith.constant 0 : i32
    %0 = arith.cmpi eq, %arg1, %c0_i32 : i32
    %1 = arith.extui %0 : i1 to i32
    %c0_i32_0 = arith.constant 0 : i32
    %2 = arith.cmpi ne, %1, %c0_i32_0 : i32
    scf.if %2 {
      %cst_16 = arith.constant 0.000000e+00 : f32
      %19 = vector.broadcast %cst_16 : f32 to vector<8x1xf32>
      %c0_17 = arith.constant 0 : index
      %c0_18 = arith.constant 0 : index
      %20 = vector.load %arg8[%c0_17, %c0_18] : memref<8x1xf32, #tpu.memory_space<vmem>>, vector<8x1xf32>
      tpu.vector_store %arg8[%c0_17, %c0_18], %19 {strides = array<i32>} : memref<8x1xf32, #tpu.memory_space<vmem>>, vector<8x1xf32>,
    } else {
    }
    %c0 = arith.constant 0 : index
    %c0_1 = arith.constant 0 : index
    %3 = vector.load %arg3[%c0, %c0_1] : memref<8x16xf32, #tpu.memory_space<vmem>>, vector<8x16xf32>
    %c0_2 = arith.constant 0 : index
    %c0_3 = arith.constant 0 : index
    %4 = vector.load %arg4[%c0_2, %c0_3] : memref<16x32xf32, #tpu.memory_space<vmem>>, vector<16x32xf32>
    %cst = arith.constant dense<0.000000e+00> : vector<8x32xf32>
    %5 = tpu.matmul %3, %4, %cst {dimension_numbers = #tpu.dot_dimension_numbers<[1], [0], [0], [1], [0, 0, 1, 1], [], []>} : vector<8x16xf32>, vector<16x32xf32>, vector<8x32xf32> -> vector<8x32xf32>
    %c0_4 = arith.constant 0 : index
    %c0_5 = arith.constant 0 : index
    %6 = vector.load %arg5[%c0_4, %c0_5] : memref<1x32xf32, #tpu.memory_space<vmem>>, vector<1x32xf32>
    %7 = vector.broadcast %6 : vector<1x32xf32> to vector<8x32xf32>
    %8 = arith.addf %5, %7 : vector<8x32xf32>
    %cst_6 = arith.constant 0.000000e+00 : f32
    %9 = vector.broadcast %cst_6 : f32 to vector<8x32xf32>
    %10 = arith.maximumf %8, %9 : vector<8x32xf32>
    %c0_7 = arith.constant 0 : index
    %c0_8 = arith.constant 0 : index
    %11 = vector.load %arg8[%c0_7, %c0_8] : memref<8x1xf32, #tpu.memory_space<vmem>>, vector<8x1xf32>
    %c0_9 = arith.constant 0 : index
    %c0_10 = arith.constant 0 : index
    %12 = vector.load %arg6[%c0_9, %c0_10] : memref<32x1xf32, #tpu.memory_space<vmem>>, vector<32x1xf32>
    %cst_11 = arith.constant dense<0.000000e+00> : vector<8x1xf32>
    %13 = tpu.matmul %10, %12, %cst_11 {dimension_numbers = #tpu.dot_dimension_numbers<[1], [0], [0], [1], [0, 0, 1, 1], [], []>} : vector<8x32xf32>, vector<32x1xf32>, vector<8x1xf32> -> vector<8x1xf32>
    %14 = arith.addf %11, %13 : vector<8x1xf32>
    %c0_12 = arith.constant 0 : index
    %c0_13 = arith.constant 0 : index
    %15 = vector.load %arg8[%c0_12, %c0_13] : memref<8x1xf32, #tpu.memory_space<vmem>>, vector<8x1xf32>
    tpu.vector_store %arg8[%c0_12, %c0_13], %14 {strides = array<i32>} : memref<8x1xf32, #tpu.memory_space<vmem>>, vector<8x1xf32>,
    %c0_i32_14 = arith.constant 0 : i32
    %16 = arith.cmpi eq, %arg1, %c0_i32_14 : i32
    %17 = arith.extui %16 : i1 to i32
    %c0_i32_15 = arith.constant 0 : i32
    %18 = arith.cmpi ne, %17, %c0_i32_15 : i32
    scf.if %18 {
      %c0_16 = arith.constant 0 : index
      %c0_17 = arith.constant 0 : index
      %19 = vector.load %arg8[%c0_16, %c0_17] : memref<8x1xf32, #tpu.memory_space<vmem>>, vector<8x1xf32>
      %c0_18 = arith.constant 0 : index
      %20 = memref.load %arg2[%c0_18] : memref<1xf32, #tpu.memory_space<smem>>
      %21 = vector.broadcast %20 : f32 to vector<8x1xf32>
      %22 = arith.addf %19, %21 : vector<8x1xf32>
      %23 = arith.negf %22 : vector<8x1xf32>
      %24 = math.exp %23 : vector<8x1xf32>
      %cst_19 = arith.constant 1.000000e+00 : f32
      %25 = vector.broadcast %cst_19 : f32 to vector<8x1xf32>
      %26 = arith.addf %25, %24 : vector<8x1xf32>
      %27 = arith.divf %25, %26 : vector<8x1xf32>
      %c0_20 = arith.constant 0 : index
      %c0_21 = arith.constant 0 : index
      %28 = vector.load %arg7[%c0_20, %c0_21] : memref<8x1xf32, #tpu.memory_space<vmem>>, vector<8x1xf32>
      tpu.vector_store %arg7[%c0_20, %c0_21], %27 {strides = array<i32>} : memref<8x1xf32, #tpu.memory_space<vmem>>, vector<8x1xf32>,
    } else {
    }
    return
  }
  func.func @transform_0(%arg0: i32, %arg1: i32, %arg2: memref<1xf32, #tpu.memory_space<smem>>) -> (i32, i32) {
    %c0_i32 = arith.constant 0 : i32
    %c0_i32_0 = arith.constant 0 : i32
    return %arg0, %c0_i32 : i32, i32
  }
  func.func @transform_1(%arg0: i32, %arg1: i32, %arg2: memref<1xf32, #tpu.memory_space<smem>>) -> (i32, i32) {
    %c0_i32 = arith.constant 0 : i32
    %c0_i32_0 = arith.constant 0 : i32
    return %c0_i32, %arg1 : i32, i32
  }
  func.func @transform_2(%arg0: i32, %arg1: i32, %arg2: memref<1xf32, #tpu.memory_space<smem>>) -> (i32, i32) {
    %c0_i32 = arith.constant 0 : i32
    %c0_i32_0 = arith.constant 0 : i32
    return %c0_i32, %arg1 : i32, i32
  }
  func.func @transform_3(%arg0: i32, %arg1: i32, %arg2: memref<1xf32, #tpu.memory_space<smem>>) -> (i32, i32) {
    %c0_i32 = arith.constant 0 : i32
    %c0_i32_0 = arith.constant 0 : i32
    return %arg1, %c0_i32 : i32, i32
  }
  func.func @transform_4(%arg0: i32, %arg1: i32, %arg2: memref<1xf32, #tpu.memory_space<smem>>) -> (i32, i32) {
    %c0_i32 = arith.constant 0 : i32
    %c0_i32_0 = arith.constant 0 : i32
    return %arg0, %c0_i32 : i32, i32
  }
}

</mosaic_0001>

<bundles_post_ra>
// kernel: tpu_custom_call.1
= control target key start
LH: loop header
LB: loop body
LE: loop exit
PB: predicated region body
PF: predicated region fallthrough
CT: control target
= control target key end

     0   :  { %v246_v0 = vmov 0.0   ;;  %vm247_vm0 = vmmov 0   ;;  %vm35_vm1 = vcmask 130048   ;;  %vm23_vm2 = vcmask 7168   ;;  %s311_s2 = inlined_call_operand.vmem [shape: f32[16,32], index: 2, kind: input, shape index: {}]   ;;  %s312_s1 = inlined_call_operand.vmem [shape: f32[8,16], index: 1, kind: input, shape index: {}]   ;;  %s313_s4 = inlined_call_operand.vmem [shape: f32[32,1], index: 4, kind: input, shape index: {}]   ;;  %s314_s3 = inlined_call_operand.vmem [shape: f32[1,32], index: 3, kind: input, shape index: {}]   ;;  %s315_s0 = inlined_call_operand.<no memory space> [shape: f32[1], index: 0, kind: input, shape index: {}]   ;;  %s316_s5 = inlined_call_operand.vmem [shape: f32[8,1], index: 5, kind: output, shape index: {}]  }
   0x1   :  { %222 = vmatprep.subr.mxu0 %v246_v0  ;;  %v27_v1 = vld [vmem:[%s311_s2 + $0x8] sm:$0xff]  ;;  %v26_v2 = vld [vmem:[%s311_s2] sm:$0xff]  ;;  %226 = vmatprep.mubr.msk.f32.mxu0 %vm247_vm0, %v246_v0  ;;  %v114_v4 = vld [vmem:[%s313_s4 + $0x18] sm:$0xff]  ;;  %24 = vst.msk [vmem:[#allocation2] sm:$0xff] %vm23_vm2, %v246_v0  ;;  %vm115_vm3 = vcmask 261120   ;;  %v197_v17 = vstv %s315_s0 }
   0x2   :  { %223 = vmatpush3.msra.mxu0 %v27_v1  ;;  %v25_v3 = vld [vmem:[%s312_s1] sm:$0xff]  ;;  %229 = vmatprep.subr.mxu1 %v246_v0  ;;  %v113_v5 = vld [vmem:[%s313_s4 + $0x10] sm:$0xff]  ;;  %v112_v6 = vld [vmem:[%s313_s4 + $0x8] sm:$0xff] }
   0x3   :  { %224 = vmatprep.subr.mxu0 %v246_v0  ;;  %230 = vmatpush3.msra.mxu1 %v114_v4  ;;  %v111_v7 = vld [vmem:[%s313_s4] sm:$0xff] }
   0x4   :  { %225 = vmatpush3.msra.mxu0 %v26_v2  ;;  %231 = vmatprep.subr.mxu1 %v246_v0  ;;  %v210_v8 = vld [vmem:[%s314_s3] ss:$0 sm:$0xff] }
   0x5   :  { %227 = vmatmul.mubr.msk.f32.vlgmr.msra.gmra.mxu0 %vm35_vm1, %v25_v3  ;;  %237 = vmatprep.mubr.msk.f32.mxu1 %vm247_vm0, %v246_v0 }
   0x6   :  { %232 = vmatpush3.msra.mxu1 %v113_v5 }
   0x7   :  { %233 = vmatprep.subr.mxu1 %v246_v0 }
   0x8   :  { %234 = vmatpush3.msra.mxu1 %v112_v6  ;;  %v110_v13 = vld [vmem:[#allocation2] sm:$0xff] }
   0x9   :  { %235 = vmatprep.subr.mxu1 %v246_v0 }
   0xa   :  { %236 = vmatpush3.msra.mxu1 %v111_v7 }
  0xc5   :  { %v105_v9 = vpop.f32.mrf.mxu0 }
  0xc6   :  { %v106_v10 = vadd.f32 %v210_v8, %v105_v9 }
  0xc7   :  { %v228_v11 = vpop.f32.mrf.mxu0 }
  0xc8   :  { %v109_v12 = vmax.f32 %v106_v10, 0.0 }
  0xca   :  { %238 = vmatmul.mubr.msk.f32.vlgmr.msra.gmra.mxu1 %vm115_vm3, %v109_v12 }
 0x18a   :  { %v185_v14 = vpop.f32.mrf.mxu1 }
 0x18b   :  { %v189_v15 = vadd.f32 %v185_v14, %v110_v13 }
 0x18c   :  { %v239_v16 = vpop.f32.mrf.mxu1 }
 0x18d   :  { %191 = vst.msk [vmem:[#allocation2] sm:$0xff] %vm23_vm2, %v189_v15 }
 0x194   :  { %v195_v18 = vld [vmem:[#allocation2] sm:$0xff] }
 0x195   :  { %v198_v19 = vadd.f32 %v197_v17, %v195_v18 }
 0x197   :  { %v213_v20 = vmul.f32 -1.442695, %v198_v19 }
 0x199   :  { %242 = vpow2.f32 %v213_v20 }
 0x1a6   :  { %v243_v21 = vpop.eup %242 }
 0x1a7   :  { %v202_v22 = vadd.f32 1.0, %v243_v21 }
 0x1a9   :  { %244 = vrcp.f32 %v202_v22 }
 0x1b6   :  { %v245_v23 = vpop.eup %244 }
 0x1b7   :  { %205 = vst.msk [vmem:[%s316_s5] sm:$0xff] %vm23_vm2, %v245_v23 }

</bundles_post_ra>
